<compile_context>
chip_gen: v5e
topology: v5e:2x2
jax: 0.10.0
libtpu: 0.0.40
codegen_flags: <defaults>
</compile_context>

<pallas_src>
import copy
import functools

import jax
import jax.numpy as jnp
from jax.experimental import pallas as pl
from jax.experimental.pallas import tpu as pltpu

LANE = 128  # vreg lane width; all feature dims are zero-padded up to this.


def _round_up(v, m):
    return ((v + m - 1) // m) * m


# ----------------------------- Fused Pallas kernel -----------------------------

def _fused_mlp_kernel(schedule, out_map, n_lin, *refs):
    """Fused forward for a Linear/ReLU chain on one (TILE_M, 128) batch tile.

    schedule : static tuple of ('linear', linear_idx) / ('relu', None)
    out_map  : static {layer_index -> output_ref_index}
    refs     : (x_ref, [w_stack_ref, b_stack_ref,] *out_refs)
               x_ref   : (TILE_M, 128)   bf16, lane-dense padded input tile
               w_stack : (n_lin,128,128) bf16, pre-transposed padded weights
               b_stack : (n_lin,  1,128) f32,  padded biases
               out_refs: (TILE_M, 128)   f32 each
    """
    x_ref = refs[0]
    if n_lin > 0:
        w_ref, b_ref = refs[1], refs[2]
        out_refs = refs[3:]
    else:
        out_refs = refs[1:]

    h = x_ref[...]  # bf16
    for i, (kind, pi) in enumerate(schedule):
        if kind == "linear":
            # bf16 MXU operands, f32 accumulation; bias add stays in f32.
            h = jnp.dot(h.astype(jnp.bfloat16), w_ref[pi],
                        preferred_element_type=jnp.float32) + b_ref[pi]
        else:  # relu — f32 VPU op, hides under MXU time
            h = jnp.maximum(h, 0.0)
        if i in out_map:
            o = out_refs[out_map[i]]
            o[...] = h.astype(o.dtype)


_FUSED_CACHE = {}


def _get_fused_call(schedule, out_items, n_lin, tile_m, grid_m, m_pad):
    """Build (or fetch cached) jitted pallas_call for a given layer schedule."""
    key = (schedule, out_items, n_lin, tile_m, grid_m, m_pad)
    fn = _FUSED_CACHE.get(key)
    if fn is not None:
        return fn

    out_map = dict(out_items)
    kernel = functools.partial(_fused_mlp_kernel, schedule, out_map, n_lin)
    n_out = len(out_items)

    in_specs = [pl.BlockSpec((tile_m, LANE), lambda i: (i, 0))]
    if n_lin > 0:
        # Weights/biases: whole-array blocks with a constant index_map, so they
        # are DMA'd once and stay resident in VMEM across all batch tiles.
        in_specs += [
            pl.BlockSpec((n_lin, LANE, LANE), lambda i: (0, 0, 0)),
            pl.BlockSpec((n_lin, 1, LANE), lambda i: (0, 0, 0)),
        ]
    out_specs = tuple(pl.BlockSpec((tile_m, LANE), lambda i: (i, 0))
                      for _ in range(n_out))
    out_shape = tuple(jax.ShapeDtypeStruct((m_pad, LANE), jnp.float32)
                      for _ in range(n_out))

    fn = jax.jit(pl.pallas_call(
        kernel,
        grid=(grid_m,),
        out_shape=out_shape,
        in_specs=in_specs,
        out_specs=out_specs,
        compiler_params=pltpu.CompilerParams(
            dimension_semantics=("parallel",),          # both v7x TensorCores
            vmem_limit_bytes=32 * 1024 * 1024),         # safe on v5e/v6e/v7x
    ))
    _FUSED_CACHE[key] = fn
    return fn


def _forward_chain(x, layers, out_idx=None, packed=None):
    """Run a chain of Linear/ReLU layers through ONE fused pallas_call.

    out_idx: indices (within `layers`) whose outputs are returned (list).
    If None, only the final layer's output is returned as a single array.
    packed : optional pre-stacked ((n_lin,128,128) bf16 W, (n_lin,1,128) f32 b).
    """
    single = out_idx is None
    if single:
        out_idx = [len(layers) - 1]

    lead_shape = x.shape[:-1]
    x2 = x.reshape(-1, x.shape[-1])
    batch, feat = x2.shape
    assert feat <= LANE, "feature dim must be <= 128 for this kernel"

    schedule, feats, lin_layers = [], [], []
    for layer in layers:
        if layer.kind == "linear":
            schedule.append(("linear", len(lin_layers)))
            lin_layers.append(layer)
            feat = layer.out_features
        else:
            schedule.append(("relu", None))
        feats.append(feat)
    n_lin = len(lin_layers)

    # Batch tiling: big tiles to amortize launch/DMA cost, multiple of 8.
    tile_m = min(512, _round_up(max(batch, 1), 8))
    m_pad = _round_up(max(batch, 1), tile_m)
    grid_m = m_pad // tile_m

    # Lane-dense, zero-padded, bf16 input (padding contributes 0 to the dots).
    x_pad = jnp.zeros((m_pad, LANE), jnp.bfloat16)
    x_pad = x_pad.at[:batch, :x2.shape[-1]].set(x2.astype(jnp.bfloat16))

    params = []
    if n_lin > 0:
        if packed is None:
            packed = (jnp.stack([l.w_pad for l in lin_layers]),
                      jnp.stack([l.b_pad for l in lin_layers]))
        params = list(packed)

    out_items = tuple((i, j) for j, i in enumerate(out_idx))
    fn = _get_fused_call(tuple(schedule), out_items, n_lin, tile_m, grid_m, m_pad)
    outs = fn(x_pad, *params)

    results = [outs[j][:batch, :feats[i]].reshape(*lead_shape, feats[i])
               for i, j in out_items]
    return results[0] if single else results


# ----------------------------- Layer wrappers -------------------------------

class LinearLayer:
    """Equivalent of nn.Linear(in_features, out_features), Pallas-backed."""

    kind = "linear"

    def __init__(self, in_features, out_features, key):
        # TODO(synk): support feature dims > 128 by tiling the K/N axes.
        assert in_features <= LANE and out_features <= LANE
        self.in_features = in_features
        self.out_features = out_features
        k_w, k_b = jax.random.split(key)
        bound = 1.0 / (in_features ** 0.5)
        # PyTorch-layout (Out, In) f32 weight kept for reference checks.
        self.weight = jax.random.uniform(
            k_w, (out_features, in_features), jnp.float32, -bound, bound)
        self.bias = jax.random.uniform(
            k_b, (out_features,), jnp.float32, -bound, bound)
        # Pre-transposed, zero-padded to 128x128, bf16 MXU operand (built ONCE).
        w_pad = jnp.zeros((LANE, LANE), jnp.float32)
        w_pad = w_pad.at[:in_features, :out_features].set(self.weight.T)
        self.w_pad = w_pad.astype(jnp.bfloat16)                 # (128, 128) bf16
        b_pad = jnp.zeros((1, LANE), jnp.float32)
        self.b_pad = b_pad.at[0, :out_features].set(self.bias)  # (1, 128)  f32

    def __call__(self, x):
        return _forward_chain(x, [self])


class ReLULayer:
    """Equivalent of nn.ReLU(), Pallas-backed."""

    kind = "relu"

    def __call__(self, x):
        return _forward_chain(x, [self])


# --------------------------- MultiLayerNetwork ------------------------------

class MultiLayerNetwork:
    def __init__(self):
        self.layers = []
        self._pack_cache = {}   # chain of linear-layer positions -> stacked params

    def add(self, layer):
        self.layers.append(copy.deepcopy(layer))
        self._pack_cache.clear()

    def pop(self):
        """Remove and return the last layer (mirrors the PyTorch version)."""
        if len(self.layers) > 0:
            last_layer = self.layers[-1]
            del self.layers[-1]
            self._pack_cache.clear()
            return last_layer
        else:
            print('Warning: No layers to remove.')
            return None

    def _packed_params(self, applied_pos):
        lin_pos = tuple(p for p in applied_pos if self.layers[p].kind == "linear")
        if not lin_pos:
            return None
        packed = self._pack_cache.get(lin_pos)
        if packed is None:
            lin_layers = [self.layers[p] for p in lin_pos]
            packed = (jnp.stack([l.w_pad for l in lin_layers]),   # (n_lin,128,128) bf16
                      jnp.stack([l.b_pad for l in lin_layers]))   # (n_lin,  1,128) f32
            self._pack_cache[lin_pos] = packed
        return packed

    def forward(self, x, n_layers=None, return_intermediate=False):
        # Mirror the PyTorch loop semantics exactly (which layers run, which
        # outputs are collected, break after i == n_layers), then execute the
        # whole applied chain in ONE fused Pallas kernel.
        applied_pos, out_idx = [], []
        for i, layer in enumerate(self.layers):
            applied_pos.append(i)
            if return_intermediate and (n_layers is None or i < n_layers):
                out_idx.append(len(applied_pos) - 1)
            if i == n_layers:
                break

        if not applied_pos:
            return [] if return_intermediate else x

        applied = [self.layers[p] for p in applied_pos]
        packed = self._packed_params(applied_pos)

        if return_intermediate:
            if not out_idx:
                # Layers are pure, nothing is returned -> skip device work.
                return []
            return _forward_chain(x, applied, out_idx, packed=packed)
        return _forward_chain(x, applied, None, packed=packed)

    __call__ = forward


# --------------------------------- Main --------------------------------------

if __name__ == "__main__":
    key = jax.random.PRNGKey(0)
    k_in, k1, k2, k3 = jax.random.split(key, 4)

    batch, d_in, d_hidden, d_out = 8, 32, 64, 16
    x = jax.random.normal(k_in, (batch, d_in), jnp.float32)

    net = MultiLayerNetwork()
    net.add(LinearLayer(d_in, d_hidden, k1))
    net.add(ReLULayer())
    net.add(LinearLayer(d_hidden, d_hidden, k2))
    net.add(ReLULayer())
    net.add(LinearLayer(d_hidden, d_out, k3))

    # Plain forward through all layers (one fused pallas_call).
    y = jax.block_until_ready(net(x))
    assert y.shape == (batch, d_out), y.shape

    # Truncated / intermediate semantics like the PyTorch module.
    inter = net(x, n_layers=2, return_intermediate=True)
    inter = [jax.block_until_ready(t) for t in inter]
    assert len(inter) == 2 and inter[0].shape == (batch, d_hidden)

    y_trunc = jax.block_until_ready(net(x, n_layers=1))  # layers 0 and 1
    assert y_trunc.shape == (batch, d_hidden)

    # Cross-check against a plain-JAX reference using the same bf16-operand /
    # f32-accumulate recipe as the kernel.
    def lin(h, layer):
        return jnp.dot(h.astype(jnp.bfloat16), layer.weight.T.astype(jnp.bfloat16),
                       preferred_element_type=jnp.float32) + layer.bias

    h1 = jnp.maximum(lin(x, net.layers[0]), 0.0)
    h2 = jnp.maximum(lin(h1, net.layers[2]), 0.0)
    ref = lin(h2, net.layers[4])

    assert jnp.allclose(y, ref, atol=1e-2, rtol=1e-2), float(jnp.max(jnp.abs(y - ref)))
    assert jnp.allclose(inter[1], h1, atol=1e-2, rtol=1e-2)
    assert jnp.allclose(y_trunc, h1, atol=1e-2, rtol=1e-2)

    print("KERNEL_OK")
</pallas_src>

<mosaic_0001>
module attributes {stable_mosaic.version = 11 : i64} {
  func.func @_fused_mlp_kernel(%arg0: i32, %arg1: memref<8x128xbf16, #tpu.memory_space<vmem>>, %arg2: memref<3x128x128xbf16, #tpu.memory_space<vmem>>, %arg3: memref<3x1x128xf32, #tpu.memory_space<vmem>>, %arg4: memref<8x128xf32, #tpu.memory_space<vmem>>) attributes {dimension_semantics = [#tpu.dimension_semantics<parallel>], iteration_bounds = array<i64: 1>, scalar_prefetch = 0 : i64, scratch_operands = 0 : i64, tpu.core_type = #tpu.core_type<tc>, window_params = [{transform_indices = @transform_0, window_bounds = array<i64: 8, 128>}, {pipeline_mode = #tpu.pipeline_mode<synchronous>, transform_indices = @transform_1, window_bounds = array<i64: 3, 128, 128>}, {pipeline_mode = #tpu.pipeline_mode<synchronous>, transform_indices = @transform_2, window_bounds = array<i64: 3, 1, 128>}, {transform_indices = @transform_3, window_bounds = array<i64: 8, 128>}]} {
    %c0 = arith.constant 0 : index
    %c0_0 = arith.constant 0 : index
    %0 = vector.load %arg1[%c0, %c0_0] : memref<8x128xbf16, #tpu.memory_space<vmem>>, vector<8x128xbf16>
    %c0_1 = arith.constant 0 : index
    %c0_2 = arith.constant 0 : index
    %c0_3 = arith.constant 0 : index
    %1 = vector.load %arg2[%c0_1, %c0_2, %c0_3] : memref<3x128x128xbf16, #tpu.memory_space<vmem>>, vector<1x128x128xbf16>
    %2 = vector.shape_cast %1 : vector<1x128x128xbf16> to vector<128x128xbf16>
    %cst = arith.constant dense<0.000000e+00> : vector<8x128xf32>
    %3 = tpu.matmul %0, %2, %cst {dimension_numbers = #tpu.dot_dimension_numbers<[1], [0], [0], [1], [0, 0, 1, 1], [], []>} : vector<8x128xbf16>, vector<128x128xbf16>, vector<8x128xf32> -> vector<8x128xf32>
    %c0_4 = arith.constant 0 : index
    %c0_5 = arith.constant 0 : index
    %c0_6 = arith.constant 0 : index
    %4 = vector.load %arg3[%c0_4, %c0_5, %c0_6] : memref<3x1x128xf32, #tpu.memory_space<vmem>>, vector<1x1x128xf32>
    %5 = vector.shape_cast %4 : vector<1x1x128xf32> to vector<1x128xf32>
    %6 = vector.broadcast %5 : vector<1x128xf32> to vector<8x128xf32>
    %7 = arith.addf %3, %6 : vector<8x128xf32>
    %cst_7 = arith.constant 0.000000e+00 : f32
    %8 = vector.broadcast %cst_7 : f32 to vector<8x128xf32>
    %9 = arith.maximumf %7, %8 : vector<8x128xf32>
    %10 = arith.truncf %9 : vector<8x128xf32> to vector<8x128xbf16>
    %c1 = arith.constant 1 : index
    %c0_8 = arith.constant 0 : index
    %c0_9 = arith.constant 0 : index
    %11 = vector.load %arg2[%c1, %c0_8, %c0_9] : memref<3x128x128xbf16, #tpu.memory_space<vmem>>, vector<1x128x128xbf16>
    %12 = vector.shape_cast %11 : vector<1x128x128xbf16> to vector<128x128xbf16>
    %cst_10 = arith.constant dense<0.000000e+00> : vector<8x128xf32>
    %13 = tpu.matmul %10, %12, %cst_10 {dimension_numbers = #tpu.dot_dimension_numbers<[1], [0], [0], [1], [0, 0, 1, 1], [], []>} : vector<8x128xbf16>, vector<128x128xbf16>, vector<8x128xf32> -> vector<8x128xf32>
    %c1_11 = arith.constant 1 : index
    %c0_12 = arith.constant 0 : index
    %c0_13 = arith.constant 0 : index
    %14 = vector.load %arg3[%c1_11, %c0_12, %c0_13] : memref<3x1x128xf32, #tpu.memory_space<vmem>>, vector<1x1x128xf32>
    %15 = vector.shape_cast %14 : vector<1x1x128xf32> to vector<1x128xf32>
    %16 = vector.broadcast %15 : vector<1x128xf32> to vector<8x128xf32>
    %17 = arith.addf %13, %16 : vector<8x128xf32>
    %cst_14 = arith.constant 0.000000e+00 : f32
    %18 = vector.broadcast %cst_14 : f32 to vector<8x128xf32>
    %19 = arith.maximumf %17, %18 : vector<8x128xf32>
    %20 = arith.truncf %19 : vector<8x128xf32> to vector<8x128xbf16>
    %c2 = arith.constant 2 : index
    %c0_15 = arith.constant 0 : index
    %c0_16 = arith.constant 0 : index
    %21 = vector.load %arg2[%c2, %c0_15, %c0_16] : memref<3x128x128xbf16, #tpu.memory_space<vmem>>, vector<1x128x128xbf16>
    %22 = vector.shape_cast %21 : vector<1x128x128xbf16> to vector<128x128xbf16>
    %cst_17 = arith.constant dense<0.000000e+00> : vector<8x128xf32>
    %23 = tpu.matmul %20, %22, %cst_17 {dimension_numbers = #tpu.dot_dimension_numbers<[1], [0], [0], [1], [0, 0, 1, 1], [], []>} : vector<8x128xbf16>, vector<128x128xbf16>, vector<8x128xf32> -> vector<8x128xf32>
    %c2_18 = arith.constant 2 : index
    %c0_19 = arith.constant 0 : index
    %c0_20 = arith.constant 0 : index
    %24 = vector.load %arg3[%c2_18, %c0_19, %c0_20] : memref<3x1x128xf32, #tpu.memory_space<vmem>>, vector<1x1x128xf32>
    %25 = vector.shape_cast %24 : vector<1x1x128xf32> to vector<1x128xf32>
    %26 = vector.broadcast %25 : vector<1x128xf32> to vector<8x128xf32>
    %27 = arith.addf %23, %26 : vector<8x128xf32>
    %c0_21 = arith.constant 0 : index
    %c0_22 = arith.constant 0 : index
    %28 = vector.load %arg4[%c0_21, %c0_22] : memref<8x128xf32, #tpu.memory_space<vmem>>, vector<8x128xf32>
    tpu.vector_store %arg4[%c0_21, %c0_22], %27 {strides = array<i32>} : memref<8x128xf32, #tpu.memory_space<vmem>>, vector<8x128xf32>,
    return
  }
  func.func @transform_0(%arg0: i32) -> (i32, i32) {
    %c0_i32 = arith.constant 0 : i32
    %c0_i32_0 = arith.constant 0 : i32
    return %arg0, %c0_i32 : i32, i32
  }
  func.func @transform_1(%arg0: i32) -> (i32, i32, i32) {
    %c0_i32 = arith.constant 0 : i32
    %c0_i32_0 = arith.constant 0 : i32
    %c0_i32_1 = arith.constant 0 : i32
    %c0_i32_2 = arith.constant 0 : i32
    return %c0_i32, %c0_i32_0, %c0_i32_1 : i32, i32, i32
  }
  func.func @transform_2(%arg0: i32) -> (i32, i32, i32) {
    %c0_i32 = arith.constant 0 : i32
    %c0_i32_0 = arith.constant 0 : i32
    %c0_i32_1 = arith.constant 0 : i32
    %c0_i32_2 = arith.constant 0 : i32
    return %c0_i32, %c0_i32_0, %c0_i32_1 : i32, i32, i32
  }
  func.func @transform_3(%arg0: i32) -> (i32, i32) {
    %c0_i32 = arith.constant 0 : i32
    %c0_i32_0 = arith.constant 0 : i32
    return %arg0, %c0_i32 : i32, i32
  }
}

</mosaic_0001>

<bundles_post_ra>
// kernel: tpu_custom_call.1
= control target key start
LH: loop header
LB: loop body
LE: loop exit
PB: predicated region body
PF: predicated region fallthrough
CT: control target
= control target key end

     0   :  { %8 = vsyncpa [#allocation3], 0  ;;  %s604_s0 = inlined_call_operand.hbm [shape: bf16[8,128], index: 0, kind: input, shape index: {}]   ;;  %s605_s1 = inlined_call_operand.hbm [shape: bf16[3,128,128], index: 1, kind: input, shape index: {}]   ;;  %s606_s2 = inlined_call_operand.hbm [shape: f32[3,1,128], index: 2, kind: input, shape index: {}]   ;;  %s607_s3 = inlined_call_operand.hbm [shape: f32[8,128], index: 3, kind: output, shape index: {}]  }
   0x1   :  { %9 = vsyncpa [#allocation6], 0  ;;  %s26_s14 = sshll.u32 %s605_s1, 4  ;;  %s27_s14 = int_to_ptr.hbm [resolvable:$true] %s26_s14 }
   0x2   :  { %10 = vsyncpa [#allocation4], 0  ;;  %s564_s15 = smov [#allocation5]   ;;  %s16_s19 = sshll.u32 %s604_s0, 4  ;;  %s17_s19 = int_to_ptr.hbm [resolvable:$true] %s16_s19 }
   0x3   :  { %s28_s16 = sshll.u32 %s564_s15, 4  ;;  %s565_s20 = smov 64   ;;  %s29_s16 = int_to_ptr.vmem [resolvable:$true] %s28_s16 }
   0x4   :  { %s566_s21 = smov 4   ;;  %s567_s22 = smov [#allocation2]  }
   0x5   :  { %34 = dma.hbm_to_vmem [thread:$0]  %s27_s14, 3072, %s29_s16, [#allocation6], %s565_s20, %s565_s20, %s566_s21  }
   0x6   :  { %s18_s23 = sshll.u32 %s567_s22, 4  ;;  %s39_s26 = sshll.u32 %s606_s2, 4  ;;  %s19_s23 = int_to_ptr.vmem [resolvable:$true] %s18_s23  ;;  %s40_s26 = int_to_ptr.hbm [resolvable:$true] %s39_s26 }
   0x7   :  { %21 = dma.hbm_to_vmem [thread:$0]  %s17_s19, 64, %s19_s23, [#allocation3]  }
   0x8   :  { %s568_s1 = smov [#allocation7]   ;;  %s569_s28 = smov 16  }
   0x9   :  { %s41_s27 = sshll.u32 %s568_s1, 4  ;;  %s570_s29 = smov 1   ;;  %s42_s27 = int_to_ptr.vmem [resolvable:$true] %s41_s27 }
   0xa   :  { %47 = dma.hbm_to_vmem [thread:$0]  %s40_s26, 48, %s42_s27, [#allocation6], %s569_s28, %s569_s28, %s570_s29  }
   0xb   :  { %558 = dma.done.wait [#allocation3], 64  }
   0xc   :  { %559 = vsyncadd [#allocation3], 4294967232 }
   0xd   :  { %560 = dma.done.wait [#allocation6], 3120  }
   0xe   :  { %561 = vsyncadd [#allocation6], 4294964176  ;;  %v434_v0 = vld [vmem:[#allocation5 + $0x38] sm:$0xff]  ;;  %v433_v1 = vld [vmem:[#allocation5 + $0x30] sm:$0xff]  ;;  %s571_s0 = smov [#allocation8]   ;;  %s320_s5 = sshll.u32 %s607_s3, 4  ;;  %s321_s5 = int_to_ptr.hbm [resolvable:$true] %s320_s5 }
   0xf   :  { %129 = vmatpush.bf16.msra.mxu0 %v434_v0  ;;  %v442_v2 = vld [vmem:[#allocation5 + $0x78] sm:$0xff]  ;;  %v441_v3 = vld [vmem:[#allocation5 + $0x70] sm:$0xff]  ;;  %v432_v4 = vld [vmem:[#allocation5 + $0x28] sm:$0xff]  ;;  %s318_s2 = sshll.u32 %s571_s0, 4  ;;  %s319_s2 = int_to_ptr.vmem [resolvable:$true] %s318_s2 }
  0x10   :  { %214 = vmatpush.bf16.msra.mxu1 %v442_v2  ;;  %v440_v5 = vld [vmem:[#allocation5 + $0x68] sm:$0xff]  ;;  %v431_v6 = vld [vmem:[#allocation5 + $0x20] sm:$0xff]  ;;  %v430_v8 = vld [vmem:[#allocation5 + $0x18] sm:$0xff] }
  0x11   :  { %v439_v7 = vld [vmem:[#allocation5 + $0x60] sm:$0xff]  ;;  %v438_v9 = vld [vmem:[#allocation5 + $0x58] sm:$0xff]  ;;  %v429_v10 = vld [vmem:[#allocation5 + $0x10] sm:$0xff] }
  0x12   :  { %v437_v11 = vld [vmem:[#allocation5 + $0x50] sm:$0xff]  ;;  %v428_v12 = vld [vmem:[#allocation5 + $0x8] sm:$0xff]  ;;  %v427_v13 = vld [vmem:[#allocation5] sm:$0xff] }
  0x13   :  { %130 = vmatpush.bf16.msra.mxu0 %v433_v1  ;;  %v60_v14 = vld [vmem:[#allocation2] sm:$0xf]  ;;  %v436_v15 = vld [vmem:[#allocation5 + $0x48] sm:$0xff]  ;;  %v435_v16 = vld [vmem:[#allocation5 + $0x40] sm:$0xff] }
  0x14   :  { %215 = vmatpush.bf16.msra.mxu1 %v441_v3  ;;  %v450_v17 = vld [vmem:[#allocation5 + $0xb8] sm:$0xff]  ;;  %v449_v18 = vld [vmem:[#allocation5 + $0xb0] sm:$0xff]  ;;  %v448_v19 = vld [vmem:[#allocation5 + $0xa8] sm:$0xff] }
  0x15   :  { %299 = vmatpush.bf16.msra.mxu2 %v450_v17  ;;  %v447_v20 = vld [vmem:[#allocation5 + $0xa0] sm:$0xff]  ;;  %v446_v21 = vld [vmem:[#allocation5 + $0x98] sm:$0xff]  ;;  %v445_v22 = vld [vmem:[#allocation5 + $0x90] sm:$0xff] }
  0x16   :  { %v459_v23 = vld [vmem:[#allocation7] ss:$0 sm:$0xff]  ;;  %v444_v29 = vld [vmem:[#allocation5 + $0x88] sm:$0xff]  ;;  %v460_v31 = vld [vmem:[#allocation7 + $0x1] ss:$0 sm:$0xff] }
  0x17   :  { %131 = vmatpush.bf16.msra.mxu0 %v432_v4  ;;  %v443_v30 = vld [vmem:[#allocation5 + $0x80] sm:$0xff] }
  0x18   :  { %216 = vmatpush.bf16.msra.mxu1 %v440_v5  ;;  %v461_v37 = vld [vmem:[#allocation7 + $0x2] ss:$0 sm:$0xff] }
  0x19   :  { %300 = vmatpush.bf16.msra.mxu2 %v449_v18 }
  0x1b   :  { %132 = vmatpush.bf16.msra.mxu0 %v431_v6 }
  0x1c   :  { %217 = vmatpush.bf16.msra.mxu1 %v439_v7 }
  0x1d   :  { %301 = vmatpush.bf16.msra.mxu2 %v448_v19 }
  0x1f   :  { %133 = vmatpush.bf16.msra.mxu0 %v430_v8 }
  0x20   :  { %218 = vmatpush.bf16.msra.mxu1 %v438_v9 }
  0x21   :  { %302 = vmatpush.bf16.msra.mxu2 %v447_v20 }
  0x23   :  { %134 = vmatpush.bf16.msra.mxu0 %v429_v10 }
  0x24   :  { %219 = vmatpush.bf16.msra.mxu1 %v437_v11 }
  0x25   :  { %303 = vmatpush.bf16.msra.mxu2 %v446_v21 }
  0x27   :  { %135 = vmatpush.bf16.msra.mxu0 %v428_v12 }
  0x28   :  { %220 = vmatpush.bf16.msra.mxu1 %v436_v15 }
  0x29   :  { %304 = vmatpush.bf16.msra.mxu2 %v445_v22 }
  0x2b   :  { %136 = vmatpush.bf16.msra.mxu0 %v427_v13 }
  0x2c   :  { %221 = vmatpush.bf16.msra.mxu1 %v435_v16 }
  0x2d   :  { %305 = vmatpush.bf16.msra.mxu2 %v444_v29 }
  0x2e   :  { %137 = vmatmul.bf16.vlgmr.msra.gmra.mxu0 %v60_v14 }
  0x31   :  { %306 = vmatpush.bf16.msra.mxu2 %v443_v30 }
  0xab   :  { %v138_v24 = vpop.f32.mrf.mxu0 }
  0xac   :  { %v139_v25 = vadd.f32 %v459_v23, %v138_v24 }
  0xae   :  { %v142_v26 = vmax.f32 %v139_v25, 0.0 }
  0xb0   :  { %v143_v27 = vpack.c.bf16 %v142_v26, %v142_v26 }
  0xb2   :  { %222 = vmatmul.bf16.vlgmr.msra.gmra.mxu1 %v143_v27 }
  0xb3   :  { %v140_v28 = vpop.f32.mrf.mxu0 }
 0x12f   :  { %v223_v32 = vpop.f32.mrf.mxu1 }
 0x130   :  { %v224_v33 = vadd.f32 %v460_v31, %v223_v32 }
 0x132   :  { %v227_v34 = vmax.f32 %v224_v33, 0.0 }
 0x134   :  { %v228_v35 = vpack.c.bf16 %v227_v34, %v227_v34 }
 0x136   :  { %307 = vmatmul.bf16.vlgmr.msra.gmra.mxu2 %v228_v35 }
 0x137   :  { %v225_v36 = vpop.f32.mrf.mxu1 }
 0x1b9   :  { %v308_v38 = vpop.f32.mrf.mxu2 }
 0x1ba   :  { %v309_v39 = vadd.f32 %v461_v37, %v308_v38 }
 0x1bc   :  { %312 = vst [vmem:[#allocation8] sm:$0xff] %v309_v39 }
 0x1bd   :  { %323 = dma.vmem_to_hbm [thread:$0]  %s319_s2, 128, %s321_s5, [#allocation4]  }
 0x1c1   :  { %v310_v40 = vpop.f32.mrf.mxu2 }
 0x1c2   :  { %562 = dma.done.wait [#allocation4], 128  }
 0x1c3   :  { %563 = vsyncadd [#allocation4], 4294967168 }
 0x1c4   :  { %328 = vsyncpa [#allocation3], 1 }
 0x1c5   :  { %329 = vsyncpa [#allocation6], 1 }
 0x1c6   :  { %330 = vsyncpa [#allocation4], 1 }

</bundles_post_ra>
